<compile_context>
chip_gen: v7x
topology: tpu7x:2x2x1
jax: 0.10.0
libtpu: 0.0.40
codegen_flags: <defaults>
</compile_context>

<pallas_src>
import jax
import jax.numpy as jnp
from jax.experimental import pallas as pl
from jax.experimental.pallas import tpu as pltpu

NUM_CLASSES = 103
IN_DIM, H1, H2 = 512, 256, 128
OUT_PAD = 128  # lane-dense padded output width (103 -> 128)


def mlp_kernel(x_ref, w1_ref, b1_ref, w2_ref, b2_ref, w3_ref, b3_ref, o_ref):
    # One (TB, 512) batch tile per grid step; weights are VMEM-resident
    # (constant index_map) so only x/out move per step.
    x = x_ref[...]  # bf16 (TB, 512)

    # Layer 1: Linear(512 -> 256) + ReLU   (Dropout = identity at inference)
    h1 = jnp.dot(x, w1_ref[...], preferred_element_type=jnp.float32) + b1_ref[...]
    h1 = jnp.maximum(h1, 0.0).astype(jnp.bfloat16)

    # Layer 2: Linear(256 -> 128) + ReLU   (Dropout = identity at inference)
    h2 = jnp.dot(h1, w2_ref[...], preferred_element_type=jnp.float32) + b2_ref[...]
    h2 = jnp.maximum(h2, 0.0).astype(jnp.bfloat16)

    # Layer 3: Linear(128 -> 103), padded to 128 lanes (cols 103..127 are zero).
    out = jnp.dot(h2, w3_ref[...], preferred_element_type=jnp.float32) + b3_ref[...]
    o_ref[...] = out.astype(o_ref.dtype)


def _batch_tile(B):
    # Small batches: one 8-aligned tile (block == full padded array).
    # Large batches: 256-row tiles (fills the MXU M dimension on v6e/v7x,
    # 2x128 rows on v5e) while keeping the per-step VMEM footprint tiny.
    if B <= 256:
        return max(8, ((B + 7) // 8) * 8)
    return 256


def net_forward(x, packed):
    """x: (B, 512) float32; packed: dict from pack_params()."""
    B = x.shape[0]
    TB = _batch_tile(B)
    Bp = pl.cdiv(B, TB) * TB

    xb = x.astype(jnp.bfloat16)
    if Bp != B:
        xb = jnp.pad(xb, ((0, Bp - B), (0, 0)))

    w1, b1 = packed["w1"], packed["b1"]
    w2, b2 = packed["w2"], packed["b2"]
    w3, b3 = packed["w3"], packed["b3"]

    def const(i):
        return (0, 0)

    flops = 2 * Bp * (IN_DIM * H1 + H1 * H2 + H2 * OUT_PAD)
    weight_bytes = (IN_DIM * H1 + H1 * H2 + H2 * OUT_PAD) * 2 + (H1 + H2 + OUT_PAD) * 4
    bytes_accessed = weight_bytes + Bp * IN_DIM * 2 + Bp * OUT_PAD * 4

    out = pl.pallas_call(
        mlp_kernel,
        out_shape=jax.ShapeDtypeStruct((Bp, OUT_PAD), jnp.float32),
        grid=(Bp // TB,),
        in_specs=[
            pl.BlockSpec((TB, IN_DIM), lambda i: (i, 0)),   # x: tiled over batch
            pl.BlockSpec((IN_DIM, H1), const),              # weights/biases: resident
            pl.BlockSpec((1, H1), const),
            pl.BlockSpec((H1, H2), const),
            pl.BlockSpec((1, H2), const),
            pl.BlockSpec((H2, OUT_PAD), const),
            pl.BlockSpec((1, OUT_PAD), const),
        ],
        out_specs=pl.BlockSpec((TB, OUT_PAD), lambda i: (i, 0)),
        compiler_params=pltpu.CompilerParams(
            dimension_semantics=("parallel",),
            vmem_limit_bytes=32 * 1024 * 1024,
        ),
        cost_estimate=pl.CostEstimate(
            flops=flops, transcendentals=0, bytes_accessed=bytes_accessed),
    )(xb, w1, b1, w2, b2, w3, b3)

    return out[:B, :NUM_CLASSES]


def init_params(key):
    """Deterministic init mirroring PyTorch Linear default (uniform +-1/sqrt(fan_in)).
    Weights stored as (in_features, out_features) so the kernel computes y = x @ W + b."""
    ks = jax.random.split(key, 6)

    def linear(kw, kb, fan_in, fan_out):
        bound = 1.0 / jnp.sqrt(jnp.float32(fan_in))
        w = jax.random.uniform(kw, (fan_in, fan_out), jnp.float32, -bound, bound)
        b = jax.random.uniform(kb, (1, fan_out), jnp.float32, -bound, bound)
        return w, b

    w1, b1 = linear(ks[0], ks[1], IN_DIM, H1)
    w2, b2 = linear(ks[2], ks[3], H1, H2)
    w3, b3 = linear(ks[4], ks[5], H2, NUM_CLASSES)
    return dict(w1=w1, b1=b1, w2=w2, b2=b2, w3=w3, b3=b3)


def pack_params(params):
    """One-time setup: cast weights to bf16 and pad the final layer to 128 lanes."""
    w3p = jnp.zeros((H2, OUT_PAD), jnp.float32).at[:, :NUM_CLASSES].set(params["w3"])
    b3p = jnp.zeros((1, OUT_PAD), jnp.float32).at[:, :NUM_CLASSES].set(params["b3"])
    return dict(
        w1=params["w1"].astype(jnp.bfloat16),
        b1=params["b1"].astype(jnp.float32),
        w2=params["w2"].astype(jnp.bfloat16),
        b2=params["b2"].astype(jnp.float32),
        w3=w3p.astype(jnp.bfloat16),
        b3=b3p,
    )


def reference_forward(x, packed):
    """Pure-JAX reference with identical numerics (bf16 operands, f32 accumulate)."""
    xb = x.astype(jnp.bfloat16)
    h1 = jnp.maximum(
        jnp.dot(xb, packed["w1"], preferred_element_type=jnp.float32) + packed["b1"], 0.0
    ).astype(jnp.bfloat16)
    h2 = jnp.maximum(
        jnp.dot(h1, packed["w2"], preferred_element_type=jnp.float32) + packed["b2"], 0.0
    ).astype(jnp.bfloat16)
    out = jnp.dot(h2, packed["w3"], preferred_element_type=jnp.float32) + packed["b3"]
    return out[:, :NUM_CLASSES]


if __name__ == "__main__":
    key = jax.random.PRNGKey(0)
    kp, kx = jax.random.split(key)
    params = init_params(kp)
    packed = pack_params(params)

    B = 8  # small batch for the smoke test; kernel tiles/scales to large B
    x = jax.random.normal(kx, (B, IN_DIM), jnp.float32)

    out = jax.block_until_ready(net_forward(x, packed))
    ref = jax.block_until_ready(reference_forward(x, packed))

    assert out.shape == (B, NUM_CLASSES)
    assert jnp.allclose(out, ref, atol=2e-2, rtol=2e-2)
    print("KERNEL_OK")
</pallas_src>

<mosaic_0001>
module attributes {stable_mosaic.version = 11 : i64} {
  func.func @mlp_kernel(%arg0: i32, %arg1: memref<8x512xbf16, #tpu.memory_space<vmem>>, %arg2: memref<512x256xbf16, #tpu.memory_space<vmem>>, %arg3: memref<1x256xf32, #tpu.memory_space<vmem>>, %arg4: memref<256x128xbf16, #tpu.memory_space<vmem>>, %arg5: memref<1x128xf32, #tpu.memory_space<vmem>>, %arg6: memref<128x128xbf16, #tpu.memory_space<vmem>>, %arg7: memref<1x128xf32, #tpu.memory_space<vmem>>, %arg8: memref<8x128xf32, #tpu.memory_space<vmem>>) attributes {dimension_semantics = [#tpu.dimension_semantics<parallel>], iteration_bounds = array<i64: 1>, scalar_prefetch = 0 : i64, scratch_operands = 0 : i64, tpu.core_type = #tpu.core_type<tc>, window_params = [{transform_indices = @transform_0, window_bounds = array<i64: 8, 512>}, {pipeline_mode = #tpu.pipeline_mode<synchronous>, transform_indices = @transform_1, window_bounds = array<i64: 512, 256>}, {pipeline_mode = #tpu.pipeline_mode<synchronous>, transform_indices = @transform_2, window_bounds = array<i64: 1, 256>}, {pipeline_mode = #tpu.pipeline_mode<synchronous>, transform_indices = @transform_3, window_bounds = array<i64: 256, 128>}, {pipeline_mode = #tpu.pipeline_mode<synchronous>, transform_indices = @transform_4, window_bounds = array<i64: 1, 128>}, {pipeline_mode = #tpu.pipeline_mode<synchronous>, transform_indices = @transform_5, window_bounds = array<i64: 128, 128>}, {pipeline_mode = #tpu.pipeline_mode<synchronous>, transform_indices = @transform_6, window_bounds = array<i64: 1, 128>}, {transform_indices = @transform_7, window_bounds = array<i64: 8, 128>}]} {
    %c0 = arith.constant 0 : index
    %c0_0 = arith.constant 0 : index
    %0 = vector.load %arg1[%c0, %c0_0] : memref<8x512xbf16, #tpu.memory_space<vmem>>, vector<8x512xbf16>
    %c0_1 = arith.constant 0 : index
    %c0_2 = arith.constant 0 : index
    %1 = vector.load %arg2[%c0_1, %c0_2] : memref<512x256xbf16, #tpu.memory_space<vmem>>, vector<512x256xbf16>
    %cst = arith.constant dense<0.000000e+00> : vector<8x256xf32>
    %2 = tpu.matmul %0, %1, %cst {dimension_numbers = #tpu.dot_dimension_numbers<[1], [0], [0], [1], [0, 0, 1, 1], [], []>} : vector<8x512xbf16>, vector<512x256xbf16>, vector<8x256xf32> -> vector<8x256xf32>
    %c0_3 = arith.constant 0 : index
    %c0_4 = arith.constant 0 : index
    %3 = vector.load %arg3[%c0_3, %c0_4] : memref<1x256xf32, #tpu.memory_space<vmem>>, vector<1x256xf32>
    %4 = vector.broadcast %3 : vector<1x256xf32> to vector<8x256xf32>
    %5 = arith.addf %2, %4 : vector<8x256xf32>
    %cst_5 = arith.constant 0.000000e+00 : f32
    %6 = vector.broadcast %cst_5 : f32 to vector<8x256xf32>
    %7 = arith.maximumf %5, %6 : vector<8x256xf32>
    %8 = arith.truncf %7 : vector<8x256xf32> to vector<8x256xbf16>
    %c0_6 = arith.constant 0 : index
    %c0_7 = arith.constant 0 : index
    %9 = vector.load %arg4[%c0_6, %c0_7] : memref<256x128xbf16, #tpu.memory_space<vmem>>, vector<256x128xbf16>
    %cst_8 = arith.constant dense<0.000000e+00> : vector<8x128xf32>
    %10 = tpu.matmul %8, %9, %cst_8 {dimension_numbers = #tpu.dot_dimension_numbers<[1], [0], [0], [1], [0, 0, 1, 1], [], []>} : vector<8x256xbf16>, vector<256x128xbf16>, vector<8x128xf32> -> vector<8x128xf32>
    %c0_9 = arith.constant 0 : index
    %c0_10 = arith.constant 0 : index
    %11 = vector.load %arg5[%c0_9, %c0_10] : memref<1x128xf32, #tpu.memory_space<vmem>>, vector<1x128xf32>
    %12 = vector.broadcast %11 : vector<1x128xf32> to vector<8x128xf32>
    %13 = arith.addf %10, %12 : vector<8x128xf32>
    %cst_11 = arith.constant 0.000000e+00 : f32
    %14 = vector.broadcast %cst_11 : f32 to vector<8x128xf32>
    %15 = arith.maximumf %13, %14 : vector<8x128xf32>
    %16 = arith.truncf %15 : vector<8x128xf32> to vector<8x128xbf16>
    %c0_12 = arith.constant 0 : index
    %c0_13 = arith.constant 0 : index
    %17 = vector.load %arg6[%c0_12, %c0_13] : memref<128x128xbf16, #tpu.memory_space<vmem>>, vector<128x128xbf16>
    %cst_14 = arith.constant dense<0.000000e+00> : vector<8x128xf32>
    %18 = tpu.matmul %16, %17, %cst_14 {dimension_numbers = #tpu.dot_dimension_numbers<[1], [0], [0], [1], [0, 0, 1, 1], [], []>} : vector<8x128xbf16>, vector<128x128xbf16>, vector<8x128xf32> -> vector<8x128xf32>
    %c0_15 = arith.constant 0 : index
    %c0_16 = arith.constant 0 : index
    %19 = vector.load %arg7[%c0_15, %c0_16] : memref<1x128xf32, #tpu.memory_space<vmem>>, vector<1x128xf32>
    %20 = vector.broadcast %19 : vector<1x128xf32> to vector<8x128xf32>
    %21 = arith.addf %18, %20 : vector<8x128xf32>
    %c0_17 = arith.constant 0 : index
    %c0_18 = arith.constant 0 : index
    %22 = vector.load %arg8[%c0_17, %c0_18] : memref<8x128xf32, #tpu.memory_space<vmem>>, vector<8x128xf32>
    tpu.vector_store %arg8[%c0_17, %c0_18], %21 {strides = array<i32>} : memref<8x128xf32, #tpu.memory_space<vmem>>, vector<8x128xf32>,
    return
  }
  func.func @transform_0(%arg0: i32) -> (i32, i32) {
    %c0_i32 = arith.constant 0 : i32
    %c0_i32_0 = arith.constant 0 : i32
    return %arg0, %c0_i32 : i32, i32
  }
  func.func @transform_1(%arg0: i32) -> (i32, i32) {
    %c0_i32 = arith.constant 0 : i32
    %c0_i32_0 = arith.constant 0 : i32
    %c0_i32_1 = arith.constant 0 : i32
    return %c0_i32, %c0_i32_0 : i32, i32
  }
  func.func @transform_2(%arg0: i32) -> (i32, i32) {
    %c0_i32 = arith.constant 0 : i32
    %c0_i32_0 = arith.constant 0 : i32
    %c0_i32_1 = arith.constant 0 : i32
    return %c0_i32, %c0_i32_0 : i32, i32
  }
  func.func @transform_3(%arg0: i32) -> (i32, i32) {
    %c0_i32 = arith.constant 0 : i32
    %c0_i32_0 = arith.constant 0 : i32
    %c0_i32_1 = arith.constant 0 : i32
    return %c0_i32, %c0_i32_0 : i32, i32
  }
  func.func @transform_4(%arg0: i32) -> (i32, i32) {
    %c0_i32 = arith.constant 0 : i32
    %c0_i32_0 = arith.constant 0 : i32
    %c0_i32_1 = arith.constant 0 : i32
    return %c0_i32, %c0_i32_0 : i32, i32
  }
  func.func @transform_5(%arg0: i32) -> (i32, i32) {
    %c0_i32 = arith.constant 0 : i32
    %c0_i32_0 = arith.constant 0 : i32
    %c0_i32_1 = arith.constant 0 : i32
    return %c0_i32, %c0_i32_0 : i32, i32
  }
  func.func @transform_6(%arg0: i32) -> (i32, i32) {
    %c0_i32 = arith.constant 0 : i32
    %c0_i32_0 = arith.constant 0 : i32
    %c0_i32_1 = arith.constant 0 : i32
    return %c0_i32, %c0_i32_0 : i32, i32
  }
  func.func @transform_7(%arg0: i32) -> (i32, i32) {
    %c0_i32 = arith.constant 0 : i32
    %c0_i32_0 = arith.constant 0 : i32
    return %arg0, %c0_i32 : i32, i32
  }
}

</mosaic_0001>

<bundles_post_ra>
// kernel: tpu_custom_call.1
= control target key start
LH: loop header
LB: loop body
LE: loop exit
PB: predicated region body
PF: predicated region fallthrough
CT: control target
= control target key end

     0   :  { %12 = vsyncpa [#allocation3], 0  ;;  %s1421_s0 = inlined_call_operand.hbm [shape: bf16[8,512], index: 0, kind: input, shape index: {}]   ;;  %s1422_s1 = inlined_call_operand.hbm [shape: bf16[512,256], index: 1, kind: input, shape index: {}]   ;;  %s1423_s2 = inlined_call_operand.vmem [shape: f32[1,256], index: 2, kind: input, shape index: {}]   ;;  %s1424_s3 = inlined_call_operand.hbm [shape: bf16[256,128], index: 3, kind: input, shape index: {}]   ;;  %s1425_s4 = inlined_call_operand.vmem [shape: f32[1,128], index: 4, kind: input, shape index: {}]   ;;  %s1426_s5 = inlined_call_operand.hbm [shape: bf16[128,128], index: 5, kind: input, shape index: {}]   ;;  %s1427_s6 = inlined_call_operand.vmem [shape: f32[1,128], index: 6, kind: input, shape index: {}]   ;;  %s1428_s7 = inlined_call_operand.hbm [shape: f32[8,128], index: 7, kind: output, shape index: {}]  }
   0x1   :  { %13 = vsyncpa [#allocation6], 0 }
   0x2   :  { %14 = vsyncpa [#allocation9], 0 }
   0x3   :  { %15 = vsyncpa [#allocation4], 0  ;;  %s1289_s24 = smov [#allocation5]   ;;  %s1171_s28 = scalar_lea.hbm %s1422_s1, 8192 }
   0x4   :  { %s31_s25 = sshll.u32 %s1289_s24, 4  ;;  %p1172_p0 = scmp.ne.s32.totalorder %s1422_s1, %s1171_s28  ;;  %s32_s25 = int_to_ptr.vmem [resolvable:$true] %s31_s25 }
   0x5   :  { %p1175_p1 = scmp.lt.u32.totalorder %s1171_s28, %s1422_s1 }
   0x7   :  { %p1177_p2 = pnand %p1175_p1, %p1172_p0 }
   0x9   :  { %1180 = shalt.err (!%p1177_p2)
}
   0xa   :  { %s1181_s10 = scalar_lea.vmem %s32_s25, 8192  ;;  %p1186_p4 = scmp.lt.s32.totalorder %s32_s25, %s32_s25 }
   0xb   :  { %p1182_p3 = scmp.ne.s32.totalorder %s32_s25, %s1181_s10  ;;  %p1187_p5 = scmp.lt.s32.totalorder %s1181_s10, %s1181_s10 }
   0xd   :  { %p1188_p6 = por %p1187_p5, %p1186_p4 }
   0xf   :  { %p1189_p7 = pnand %p1188_p6, %p1182_p3 }
  0x11   :  { %1192 = shalt.err (!%p1189_p7)
}
  0x12   :  { %s1290_s11 = smov 128   ;;  %s1291_s12 = smov 8  }
  0x13   :  { %37 = dma.hbm_to_vmem [thread:$0]  %s1422_s1, 8192, %s32_s25, [#allocation6], %s1290_s11, %s1290_s11, %s1291_s12  }
  0x14   :  { %s1292_s15 = smov [#allocation2]   ;;  %s1293_s17 = smov [#allocation7]  }
  0x15   :  { %s22_s16 = sshll.u32 %s1292_s15, 4  ;;  %s45_s18 = sshll.u32 %s1293_s17, 4  ;;  %s23_s16 = int_to_ptr.vmem [resolvable:$true] %s22_s16  ;;  %s46_s18 = int_to_ptr.vmem [resolvable:$true] %s45_s18 }
  0x16   :  { %s1193_s21 = scalar_lea.hbm %s1421_s0, 256 }
  0x17   :  { %p1194_p8 = scmp.ne.s32.totalorder %s1421_s0, %s1193_s21  ;;  %p1197_p9 = scmp.lt.u32.totalorder %s1193_s21, %s1421_s0 }
  0x19   :  { %p1199_p10 = pnand %p1197_p9, %p1194_p8 }
  0x1b   :  { %1202 = shalt.err (!%p1199_p10)
}
  0x1c   :  { %s1203_s1 = scalar_lea.vmem %s23_s16, 256  ;;  %p1208_p12 = scmp.lt.s32.totalorder %s23_s16, %s23_s16 }
  0x1d   :  { %p1204_p11 = scmp.ne.s32.totalorder %s23_s16, %s1203_s1  ;;  %p1209_p13 = scmp.lt.s32.totalorder %s1203_s1, %s1203_s1 }
  0x1f   :  { %p1210_p0 = por %p1209_p13, %p1208_p12 }
  0x21   :  { %p1211_p1 = pnand %p1210_p0, %p1204_p11 }
  0x23   :  { %1214 = shalt.err (!%p1211_p1)
}
  0x24   :  { %25 = dma.hbm_to_vmem [thread:$0]  %s1421_s0, 256, %s23_s16, [#allocation3]  }
  0x25   :  { %s1215_s30 = scalar_lea.hbm %s1424_s3, 2048 }
  0x26   :  { %p1216_p2 = scmp.ne.s32.totalorder %s1424_s3, %s1215_s30  ;;  %p1219_p3 = scmp.lt.u32.totalorder %s1215_s30, %s1424_s3 }
  0x28   :  { %p1221_p4 = pnand %p1219_p3, %p1216_p2 }
  0x2a   :  { %1224 = shalt.err (!%p1221_p4)
}
  0x2b   :  { %s1225_s12 = scalar_lea.vmem %s46_s18, 2048  ;;  %p1230_p6 = scmp.lt.s32.totalorder %s46_s18, %s46_s18 }
  0x2c   :  { %p1226_p5 = scmp.ne.s32.totalorder %s46_s18, %s1225_s12  ;;  %p1231_p7 = scmp.lt.s32.totalorder %s1225_s12, %s1225_s12 }
  0x2e   :  { %p1232_p8 = por %p1231_p7, %p1230_p6 }
  0x30   :  { %p1233_p9 = pnand %p1232_p8, %p1226_p5 }
  0x32   :  { %1236 = shalt.err (!%p1233_p9)
}
  0x33   :  { %s1294_s0 = smov 64   ;;  %s1295_s13 = smov 4  }
  0x34   :  { %51 = dma.hbm_to_vmem [thread:$0]  %s1424_s3, 2048, %s46_s18, [#allocation6], %s1294_s0, %s1294_s0, %s1295_s13  }
  0x35   :  { %s1296_s16 = smov [#allocation8]   ;;  %s1237_s21 = scalar_lea.hbm %s1426_s5, 1024 }
  0x36   :  { %s59_s17 = sshll.u32 %s1296_s16, 4  ;;  %p1238_p10 = scmp.ne.s32.totalorder %s1426_s5, %s1237_s21  ;;  %s60_s17 = int_to_ptr.vmem [resolvable:$true] %s59_s17 }
  0x37   :  { %p1241_p11 = scmp.lt.u32.totalorder %s1237_s21, %s1426_s5 }
  0x39   :  { %p1243_p12 = pnand %p1241_p11, %p1238_p10 }
  0x3b   :  { %1246 = shalt.err (!%p1243_p12)
}
  0x3c   :  { %s1247_s1 = scalar_lea.vmem %s60_s17, 1024  ;;  %p1252_p0 = scmp.lt.s32.totalorder %s60_s17, %s60_s17 }
  0x3d   :  { %p1248_p13 = scmp.ne.s32.totalorder %s60_s17, %s1247_s1  ;;  %p1253_p1 = scmp.lt.s32.totalorder %s1247_s1, %s1247_s1 }
  0x3f   :  { %p1254_p2 = por %p1253_p1, %p1252_p0 }
  0x41   :  { %p1255_p3 = pnand %p1254_p2, %p1248_p13 }
  0x43   :  { %1258 = shalt.err (!%p1255_p3)
}
  0x44   :  { %65 = dma.hbm_to_vmem [thread:$0]  %s1426_s5, 1024, %s60_s17, [#allocation9], %s1294_s0, %s1294_s0, %s1295_s13  }
  0x45   :  { %1281 = dma.done.wait [#allocation3], 256  }
  0x46   :  { %1282 = vsyncadd [#allocation3], 4294967040 }
  0x47   :  { %1283 = dma.done.wait [#allocation6], 10240  }
  0x48   :  { %1284 = vsyncadd [#allocation6], 4294957056 }
  0x49   :  { %1285 = dma.done.wait [#allocation9], 1024  }
  0x4a   :  { %1286 = vsyncadd [#allocation9], 4294966272  ;;  %v1047_v0 = vld [vmem:[#allocation5 + $0x4] ss:$8 sps:$4 sm:$0xff]   ;;  %v1049_v1 = vld [vmem:[#allocation5] ss:$8 sps:$4 sm:$0xff]  }
  0x4b   :  { %493 = vmatprep.subr.bf16.mxu0 %v1047_v0  ;;  %v1050_v2 = vld [vmem:[#allocation5 + $0x14] ss:$8 sps:$4 sm:$0xff]   ;;  %v1052_v3 = vld [vmem:[#allocation5 + $0x10] ss:$8 sps:$4 sm:$0xff]   ;;  %v1053_v4 = vld [vmem:[#allocation5 + $0x24] ss:$8 sps:$4 sm:$0xff]  }
  0x4c   :  { %494 = vmatpush1.bf16.msra.mxu0 %v1049_v1  ;;  %v1055_v5 = vld [vmem:[#allocation5 + $0x20] ss:$8 sps:$4 sm:$0xff]   ;;  %v1056_v6 = vld [vmem:[#allocation5 + $0x34] ss:$8 sps:$4 sm:$0xff]   ;;  %v1058_v7 = vld [vmem:[#allocation5 + $0x30] ss:$8 sps:$4 sm:$0xff]  }
  0x4d   :  { %495 = vmatprep.subr.bf16.mxu0 %v1050_v2  ;;  %v1059_v8 = vld [vmem:[#allocation5 + $0x44] ss:$8 sps:$4 sm:$0xff]   ;;  %v1061_v9 = vld [vmem:[#allocation5 + $0x40] ss:$8 sps:$4 sm:$0xff]   ;;  %v1062_v10 = vld [vmem:[#allocation5 + $0x54] ss:$8 sps:$4 sm:$0xff]  }
  0x4e   :  { %v1064_v11 = vld [vmem:[#allocation5 + $0x50] ss:$8 sps:$4 sm:$0xff]   ;;  %v1065_v12 = vld [vmem:[#allocation5 + $0x64] ss:$8 sps:$4 sm:$0xff]   ;;  %v1067_v15 = vld [vmem:[#allocation5 + $0x60] ss:$8 sps:$4 sm:$0xff]  }
  0x4f   :  { %v1388_v13 = vld [vmem:[#allocation2] sm:$0xff]  ;;  %v1071_v18 = vld [vmem:[#allocation5 + $0x84] ss:$8 sps:$4 sm:$0xff]   ;;  %v1073_v19 = vld [vmem:[#allocation5 + $0x80] ss:$8 sps:$4 sm:$0xff]   ;;  %vm1298_vm0 = vmmov 0  }
  0x50   :  { %496 = vmatpush1.bf16.msra.mxu0 %v1052_v3  ;;  %v886_v14 = vcombine.high %v1388_v13, %v1388_v13  ;;  %v1068_v16 = vld [vmem:[#allocation5 + $0x74] ss:$8 sps:$4 sm:$0xff]   ;;  %v1070_v17 = vld [vmem:[#allocation5 + $0x70] ss:$8 sps:$4 sm:$0xff]   ;;  %v1077_v22 = vld [vmem:[#allocation5 + $0xa4] ss:$8 sps:$4 sm:$0xff]   ;;  %v885_v47 = vcombine.low %v1388_v13, %v1388_v13 }
  0x51   :  { %497 = vmatprep.subr.bf16.mxu0 %v1053_v4  ;;  %v1074_v20 = vld [vmem:[#allocation5 + $0x94] ss:$8 sps:$4 sm:$0xff]   ;;  %v1076_v21 = vld [vmem:[#allocation5 + $0x90] ss:$8 sps:$4 sm:$0xff]   ;;  %v1079_v23 = vld [vmem:[#allocation5 + $0xa0] ss:$8 sps:$4 sm:$0xff]  }
  0x52   :  { %525 = vmatprep.mubr.bf16.mxu0 %v886_v14  ;;  %v1080_v24 = vld [vmem:[#allocation5 + $0xb4] ss:$8 sps:$4 sm:$0xff]   ;;  %v1082_v25 = vld [vmem:[#allocation5 + $0xb0] ss:$8 sps:$4 sm:$0xff]   ;;  %v1083_v26 = vld [vmem:[#allocation5 + $0xc4] ss:$8 sps:$4 sm:$0xff]  }
  0x53   :  { %v1147_v27 = vld [vmem:[#allocation7 + $0x40] sm:$0xff]   ;;  %v1086_v30 = vld [vmem:[#allocation5 + $0xd4] ss:$8 sps:$4 sm:$0xff]   ;;  %v1149_v31 = vld [vmem:[#allocation7 + $0x48] sm:$0xff]   ;;  %s1299_s30 = smov [#allocation10]  }
  0x54   :  { %498 = vmatpush1.bf16.msra.mxu0 %v1055_v5  ;;  %v1085_v28 = vld [vmem:[#allocation5 + $0xc0] ss:$8 sps:$4 sm:$0xff]   ;;  %979 = vmatprep.subr.bf16.mxu1 %v1147_v27  ;;  %v1151_v33 = vld [vmem:[#allocation7 + $0x50] sm:$0xff]   ;;  %v1089_v35 = vld [vmem:[#allocation5 + $0xe4] ss:$8 sps:$4 sm:$0xff]   ;;  %s874_s8 = sshll.u32 %s1299_s30, 4  ;;  %s875_s8 = int_to_ptr.vmem [resolvable:$true] %s874_s8 }
  0x55   :  { %499 = vmatprep.subr.bf16.mxu0 %v1056_v6  ;;  %v1148_v29 = vld [vmem:[#allocation7] sm:$0xff]   ;;  %v1150_v32 = vld [vmem:[#allocation7 + $0x8] sm:$0xff]   ;;  %v1088_v34 = vld [vmem:[#allocation5 + $0xd0] ss:$8 sps:$4 sm:$0xff]   ;;  %p1264_p5 = scmp.lt.s32.totalorder %s875_s8, %s875_s8 }
  0x56   :  { %980 = vmatpush3.bf16.msra.mxu1 %v1148_v29  ;;  %v1152_v36 = vld [vmem:[#allocation7 + $0x10] sm:$0xff]   ;;  %v1153_v37 = vld [vmem:[#allocation7 + $0x58] sm:$0xff]   ;;  %v1091_v38 = vld [vmem:[#allocation5 + $0xe0] ss:$8 sps:$4 sm:$0xff]  }
  0x57   :  { %981 = vmatprep.subr.bf16.mxu1 %v1149_v31  ;;  %v1092_v39 = vld [vmem:[#allocation5 + $0xf4] ss:$8 sps:$4 sm:$0xff]   ;;  %v1155_v41 = vld [vmem:[#allocation7 + $0x60] sm:$0xff]   ;;  %v1094_v42 = vld [vmem:[#allocation5 + $0xf0] ss:$8 sps:$4 sm:$0xff]  }
  0x58   :  { %500 = vmatpush1.bf16.msra.mxu0 %v1058_v7  ;;  %v1154_v40 = vld [vmem:[#allocation7 + $0x18] sm:$0xff]   ;;  %v1156_v43 = vld [vmem:[#allocation7 + $0x20] sm:$0xff]   ;;  %v1157_v46 = vld [vmem:[#allocation7 + $0x68] sm:$0xff]  }
  0x59   :  { %501 = vmatprep.subr.bf16.mxu0 %v1059_v8  ;;  %v1099_v44 = vld [vmem:[#allocation5 + $0x104] ss:$8 sps:$4 sm:$0xff]   ;;  %v1392_v45 = vld [vmem:[#allocation2 + $0x8] sm:$0xff]  ;;  %v1097_v48 = vld [vmem:[#allocation5 + $0x100] ss:$8 sps:$4 sm:$0xff]  }
  0x5a   :  { %982 = vmatpush3.bf16.msra.mxu1 %v1150_v32  ;;  %v888_v49 = vcombine.high %v1392_v45, %v1392_v45  ;;  %v1102_v50 = vld [vmem:[#allocation5 + $0x114] ss:$8 sps:$4 sm:$0xff]   ;;  %v1158_v51 = vld [vmem:[#allocation7 + $0x28] sm:$0xff]   ;;  %v1100_v52 = vld [vmem:[#allocation5 + $0x110] ss:$8 sps:$4 sm:$0xff]  }
  0x5b   :  { %983 = vmatprep.subr.bf16.mxu1 %v1151_v33  ;;  %v1105_v53 = vld [vmem:[#allocation5 + $0x124] ss:$8 sps:$4 sm:$0xff]   ;;  %v1103_v54 = vld [vmem:[#allocation5 + $0x120] ss:$8 sps:$4 sm:$0xff]   ;;  %v1108_v55 = vld [vmem:[#allocation5 + $0x134] ss:$8 sps:$4 sm:$0xff]  }
  0x5c   :  { %502 = vmatpush1.bf16.msra.mxu0 %v1061_v9  ;;  %v1106_v56 = vld [vmem:[#allocation5 + $0x130] ss:$8 sps:$4 sm:$0xff]   ;;  %v1111_v57 = vld [vmem:[#allocation5 + $0x144] ss:$8 sps:$4 sm:$0xff]   ;;  %v1109_v58 = vld [vmem:[#allocation5 + $0x140] ss:$8 sps:$4 sm:$0xff]  }
  0x5d   :  { %503 = vmatprep.subr.bf16.mxu0 %v1062_v10  ;;  %v1114_v59 = vld [vmem:[#allocation5 + $0x154] ss:$8 sps:$4 sm:$0xff]   ;;  %v1112_v60 = vld [vmem:[#allocation5 + $0x150] ss:$8 sps:$4 sm:$0xff]   ;;  %v1117_v61 = vld [vmem:[#allocation5 + $0x164] ss:$8 sps:$4 sm:$0xff]  }
  0x5e   :  { %984 = vmatpush3.bf16.msra.mxu1 %v1152_v36  ;;  %v1115_v62 = vld [vmem:[#allocation5 + $0x160] ss:$8 sps:$4 sm:$0xff]   ;;  %v1120_v63 = vld [vmem:[#allocation5 + $0x174] ss:$8 sps:$4 sm:$0xff]   ;;  %v1118_v0 = vld [vmem:[#allocation5 + $0x170] ss:$8 sps:$4 sm:$0xff]  }
  0x5f   :  { %985 = vmatprep.subr.bf16.mxu1 %v1153_v37  ;;  %v1123_v1 = vld [vmem:[#allocation5 + $0x184] ss:$8 sps:$4 sm:$0xff]   ;;  %v1121_v2 = vld [vmem:[#allocation5 + $0x180] ss:$8 sps:$4 sm:$0xff]   ;;  %v1126_v3 = vld [vmem:[#allocation5 + $0x194] ss:$8 sps:$4 sm:$0xff]  }
  0x60   :  { %504 = vmatpush1.bf16.msra.mxu0 %v1064_v11  ;;  %v1124_v4 = vld [vmem:[#allocation5 + $0x190] ss:$8 sps:$4 sm:$0xff]   ;;  %v1129_v5 = vld [vmem:[#allocation5 + $0x1a4] ss:$8 sps:$4 sm:$0xff]   ;;  %v1127_v6 = vld [vmem:[#allocation5 + $0x1a0] ss:$8 sps:$4 sm:$0xff]  }
  0x61   :  { %505 = vmatprep.subr.bf16.mxu0 %v1065_v12  ;;  %v1132_v7 = vld [vmem:[#allocation5 + $0x1b4] ss:$8 sps:$4 sm:$0xff]   ;;  %v1130_v8 = vld [vmem:[#allocation5 + $0x1b0] ss:$8 sps:$4 sm:$0xff]   ;;  %v1135_v9 = vld [vmem:[#allocation5 + $0x1c4] ss:$8 sps:$4 sm:$0xff]  }
  0x62   :  { %986 = vmatpush3.bf16.msra.mxu1 %v1154_v40  ;;  %v1133_v10 = vld [vmem:[#allocation5 + $0x1c0] ss:$8 sps:$4 sm:$0xff]   ;;  %v1138_v11 = vld [vmem:[#allocation5 + $0x1d4] ss:$8 sps:$4 sm:$0xff]   ;;  %v1136_v12 = vld [vmem:[#allocation5 + $0x1d0] ss:$8 sps:$4 sm:$0xff]  }
  0x63   :  { %987 = vmatprep.subr.bf16.mxu1 %v1155_v41  ;;  %v1141_v13 = vld [vmem:[#allocation5 + $0x1e4] ss:$8 sps:$4 sm:$0xff]   ;;  %v1139_v14 = vld [vmem:[#allocation5 + $0x1e0] ss:$8 sps:$4 sm:$0xff]  }
  0x64   :  { %506 = vmatpush1.bf16.msra.mxu0 %v1067_v15  ;;  %v1144_v15 = vld [vmem:[#allocation5 + $0x1f4] ss:$8 sps:$4 sm:$0xff]   ;;  %v1164_v41 = vld [vmem:[#allocation8 + $0x8] sm:$0xff]  }
  0x65   :  { %507 = vmatprep.subr.bf16.mxu0 %v1068_v16  ;;  %v1142_v16 = vld [vmem:[#allocation5 + $0x1f0] ss:$8 sps:$4 sm:$0xff]  }
  0x66   :  { %988 = vmatpush3.bf16.msra.mxu1 %v1156_v43  ;;  %v1166_v43 = vld [vmem:[#allocation8 + $0x18] sm:$0xff]  }
  0x67   :  { %989 = vmatprep.subr.bf16.mxu1 %v1157_v46  ;;  %v1169_v46 = vld [vmem:[#allocation8 + $0x30] sm:$0xff]  }
  0x68   :  { %508 = vmatpush1.bf16.msra.mxu0 %v1070_v17  ;;  %v887_v17 = vcombine.low %v1392_v45, %v1392_v45  ;;  %v1168_v45 = vld [vmem:[#allocation8 + $0x28] sm:$0xff]  }
  0x69   :  { %509 = vmatprep.subr.bf16.mxu0 %v1071_v18  ;;  %v1159_v18 = vld [vmem:[#allocation7 + $0x70] sm:$0xff]  }
  0x6a   :  { %990 = vmatpush3.bf16.msra.mxu1 %v1158_v51 }
  0x6b   :  { %991 = vmatprep.subr.bf16.mxu1 %v1159_v18 }
  0x6c   :  { %510 = vmatpush1.bf16.msra.mxu0 %v1073_v19  ;;  %v1160_v19 = vld [vmem:[#allocation7 + $0x30] sm:$0xff]  }
  0x6d   :  { %511 = vmatprep.subr.bf16.mxu0 %v1074_v20  ;;  %v1161_v20 = vld [vmem:[#allocation7 + $0x78] sm:$0xff]  }
  0x6e   :  { %992 = vmatpush3.bf16.msra.mxu1 %v1160_v19 }
  0x6f   :  { %993 = vmatprep.subr.bf16.mxu1 %v1161_v20 }
  0x70   :  { %512 = vmatpush1.bf16.msra.mxu0 %v1076_v21  ;;  %v1162_v21 = vld [vmem:[#allocation7 + $0x38] sm:$0xff]  }
  0x71   :  { %513 = vmatprep.subr.bf16.mxu0 %v1077_v22  ;;  %v1297_v22 = vmov 0.0  }
  0x72   :  { %994 = vmatpush3.bf16.msra.mxu1 %v1162_v21 }
  0x73   :  { %1010 = vmatprep.subr.bf16.mxu1 %v1297_v22 }
  0x74   :  { %514 = vmatpush1.bf16.msra.mxu0 %v1079_v23  ;;  %v149_v23 = vlaneseq }
  0x75   :  { %515 = vmatprep.subr.bf16.mxu0 %v1080_v24 }
  0x76   :  { %v150_v24 = vshrl.u32 %v149_v23, 7 }
  0x78   :  { %516 = vmatpush1.bf16.msra.mxu0 %v1082_v25  ;;  %v151_v25 = vsub.s32 0, %v150_v24  ;;  %v155_v27 = vsub.s32 1, %v150_v24 }
  0x79   :  { %517 = vmatprep.subr.bf16.mxu0 %v1083_v26  ;;  %v147_v26 = vld [vmem:[%s1423_s2] sm:$0x3] }
  0x7a   :  { %v156_v29 = vrot.slane %v147_v26, %v155_v27 }
  0x7c   :  { %518 = vmatpush1.bf16.msra.mxu0 %v1085_v28  ;;  %v152_v28 = vrot.slane %v147_v26, %v151_v25 }
  0x7d   :  { %519 = vmatprep.subr.bf16.mxu0 %v1086_v30 }
  0x80   :  { %520 = vmatpush1.bf16.msra.mxu0 %v1088_v34 }
  0x81   :  { %521 = vmatprep.subr.bf16.mxu0 %v1089_v35 }
  0x84   :  { %522 = vmatpush1.bf16.msra.mxu0 %v1091_v38 }
  0x85   :  { %523 = vmatprep.subr.bf16.mxu0 %v1092_v39  ;;  %v1163_v39 = vld [vmem:[#allocation8] sm:$0xff]  }
  0x88   :  { %524 = vmatpush1.bf16.msra.mxu0 %v1094_v42  ;;  %v1165_v42 = vld [vmem:[#allocation8 + $0x10] sm:$0xff]  }
  0x89   :  { %534 = vmatprep.subr.bf16.mxu0 %v1099_v44  ;;  %v1167_v44 = vld [vmem:[#allocation8 + $0x20] sm:$0xff]  }
  0x8b   :  { %526 = vmatmul.mubr.bf16.vlgmr.msra.gmra.mrb[0].mxu0 %v885_v47  ;;  %v1170_v47 = vld [vmem:[#allocation8 + $0x38] sm:$0xff]  }
  0x8c   :  { %535 = vmatpush1.bf16.msra.mxu0 %v1097_v48  ;;  %566 = vmatprep.mubr.bf16.mxu0 %v888_v49  ;;  %v953_v49 = vld [vmem:[%s1425_s4] ss:$0 sm:$0xff]  ;;  %s1259_s4 = scalar_lea.vmem %s875_s8, 128 }
  0x8d   :  { %536 = vmatprep.subr.bf16.mxu0 %v1102_v50  ;;  %p1260_p4 = scmp.ne.s32.totalorder %s875_s8, %s1259_s4  ;;  %p1265_p6 = scmp.lt.s32.totalorder %s1259_s4, %s1259_s4 }
  0x8f   :  { %p1266_p7 = por %p1265_p6, %p1264_p5 }
  0x90   :  { %537 = vmatpush1.bf16.msra.mxu0 %v1100_v52 }
  0x91   :  { %538 = vmatprep.subr.bf16.mxu0 %v1105_v53  ;;  %p1267_p8 = pnand %p1266_p7, %p1260_p4 }
  0x94   :  { %539 = vmatpush1.bf16.msra.mxu0 %v1103_v54 }
  0x95   :  { %540 = vmatprep.subr.bf16.mxu0 %v1108_v55 }
  0x98   :  { %541 = vmatpush1.bf16.msra.mxu0 %v1106_v56 }
  0x99   :  { %542 = vmatprep.subr.bf16.mxu0 %v1111_v57  ;;  %v970_v57 = vld [vmem:[%s1427_s6] ss:$0 sm:$0xff] }
  0x9c   :  { %543 = vmatpush1.bf16.msra.mxu0 %v1109_v58 }
  0x9d   :  { %544 = vmatprep.subr.bf16.mxu0 %v1114_v59 }
  0xa0   :  { %545 = vmatpush1.bf16.msra.mxu0 %v1112_v60 }
  0xa1   :  { %546 = vmatprep.subr.bf16.mxu0 %v1117_v61 }
  0xa4   :  { %547 = vmatpush1.bf16.msra.mxu0 %v1115_v62 }
  0xa5   :  { %548 = vmatprep.subr.bf16.mxu0 %v1120_v63 }
  0xa8   :  { %549 = vmatpush1.bf16.msra.mxu0 %v1118_v0 }
  0xa9   :  { %550 = vmatprep.subr.bf16.mxu0 %v1123_v1 }
  0xac   :  { %551 = vmatpush1.bf16.msra.mxu0 %v1121_v2 }
  0xad   :  { %552 = vmatprep.subr.bf16.mxu0 %v1126_v3 }
  0xb0   :  { %553 = vmatpush1.bf16.msra.mxu0 %v1124_v4 }
  0xb1   :  { %554 = vmatprep.subr.bf16.mxu0 %v1129_v5 }
  0xb4   :  { %555 = vmatpush1.bf16.msra.mxu0 %v1127_v6 }
  0xb5   :  { %556 = vmatprep.subr.bf16.mxu0 %v1132_v7 }
  0xb8   :  { %557 = vmatpush1.bf16.msra.mxu0 %v1130_v8 }
  0xb9   :  { %558 = vmatprep.subr.bf16.mxu0 %v1135_v9 }
  0xbc   :  { %559 = vmatpush1.bf16.msra.mxu0 %v1133_v10 }
  0xbd   :  { %560 = vmatprep.subr.bf16.mxu0 %v1138_v11 }
  0xc0   :  { %561 = vmatpush1.bf16.msra.mxu0 %v1136_v12 }
  0xc1   :  { %562 = vmatprep.subr.bf16.mxu0 %v1141_v13 }
  0xc4   :  { %563 = vmatpush1.bf16.msra.mxu0 %v1139_v14 }
  0xc5   :  { %564 = vmatprep.subr.bf16.mxu0 %v1144_v15 }
  0xc8   :  { %565 = vmatpush1.bf16.msra.mxu0 %v1142_v16 }
  0xcb   :  { %567 = vmatmul.mubr.bf16.vlgmr.msra.gmra.mrb[0].mxu0 %v887_v17 }
 0x19e   :  { %v568_v30 = vpop.f32.mrb[0].mxu0 }
 0x19f   :  { %v1030_v31 = vadd.f32 %v568_v30, %v152_v28  ;;  %v570_v32 = vpop.f32.mrb[1].mxu0 }
 0x1a0   :  { %v1031_v33 = vadd.f32 %v570_v32, %v156_v29  ;;  %v572_v34 = vpop.f32.mrb[2].mxu0 }
 0x1a1   :  { %v575_v35 = vmax.f32 %v1030_v31, 0.0  ;;  %v573_v36 = vpop.f32.mrb[3].mxu0 }
 0x1a2   :  { %v576_v37 = vmax.f32 %v1031_v33, 0.0 }
 0x1a3   :  { %v577_v40 = vpack.c.bf16 %v575_v35, %v575_v35 }
 0x1a4   :  { %v578_v38 = vpack.c.bf16 %v576_v37, %v576_v37 }
 0x1a6   :  { %746 = vmatprep.mubr.bf16.mxu1 %v578_v38 }
 0x1a7   :  { %747 = vmatmul.mubr.bf16.vlgmr.msra.gmra.mrb[0].mxu1 %v577_v40 }
 0x1a8   :  { %1011 = vmatpush3.bf16.msra.mxu1 %v1163_v39  ;;  %1026 = vmatprep.mubr.msk.bf16.mxu1 %vm1298_vm0, %v1297_v22 }
 0x1a9   :  { %1012 = vmatprep.subr.bf16.mxu1 %v1297_v22 }
 0x1ac   :  { %1013 = vmatpush3.bf16.msra.mxu1 %v1164_v41 }
 0x1ad   :  { %1014 = vmatprep.subr.bf16.mxu1 %v1297_v22 }
 0x1b0   :  { %1015 = vmatpush3.bf16.msra.mxu1 %v1165_v42 }
 0x1b1   :  { %1016 = vmatprep.subr.bf16.mxu1 %v1297_v22 }
 0x1b4   :  { %1017 = vmatpush3.bf16.msra.mxu1 %v1166_v43 }
 0x1b5   :  { %1018 = vmatprep.subr.bf16.mxu1 %v1297_v22 }
 0x1b8   :  { %1019 = vmatpush3.bf16.msra.mxu1 %v1167_v44 }
 0x1b9   :  { %1020 = vmatprep.subr.bf16.mxu1 %v1297_v22 }
 0x1bc   :  { %1021 = vmatpush3.bf16.msra.mxu1 %v1168_v45 }
 0x1bd   :  { %1022 = vmatprep.subr.bf16.mxu1 %v1297_v22 }
 0x1c0   :  { %1023 = vmatpush3.bf16.msra.mxu1 %v1169_v46 }
 0x1c1   :  { %1024 = vmatprep.subr.bf16.mxu1 %v1297_v22 }
 0x1c4   :  { %1025 = vmatpush3.bf16.msra.mxu1 %v1170_v47 }
 0x27a   :  { %v995_v48 = vpop.f32.mrb[0].mxu1 }
 0x27b   :  { %v996_v50 = vpop.f32.mrb[1].mxu1 }
 0x27c   :  { %v997_v51 = vadd.f32 %v996_v50, %v995_v48  ;;  %v998_v52 = vpop.f32.mrb[2].mxu1 }
 0x27d   :  { %v999_v53 = vpop.f32.mrb[3].mxu1 }
 0x27e   :  { %v749_v54 = vadd.f32 %v997_v51, %v953_v49 }
 0x280   :  { %v754_v55 = vmax.f32 %v749_v54, 0.0 }
 0x282   :  { %v755_v56 = vpack.c.bf16 %v754_v55, %v754_v55 }
 0x284   :  { %1027 = vmatmul.mubr.bf16.vlgmr.msra.gmra.mrb[4].mxu1 %v755_v56 }
 0x357   :  { %v861_v58 = vpop.f32.mrb[4].mxu1 }
 0x358   :  { %v862_v59 = vadd.f32 %v970_v57, %v861_v58  ;;  %v1028_v60 = vpop.f32.mrb[5].mxu1 }
 0x359   :  { %v864_v61 = vpop.f32.mrb[6].mxu1 }
 0x35a   :  { %867 = vst [vmem:[#allocation10] sm:$0xff] %v862_v59  ;;  %v1029_v62 = vpop.f32.mrb[7].mxu1 }
 0x35b   :  { %1270 = shalt.err (!%p1267_p8)
}
 0x35c   :  { %s1271_s6 = scalar_lea.hbm %s1428_s7, 128 }
 0x35d   :  { %p1272_p9 = scmp.ne.s32.totalorder %s1428_s7, %s1271_s6  ;;  %p1275_p10 = scmp.lt.u32.totalorder %s1271_s6, %s1428_s7 }
 0x35f   :  { %p1277_p11 = pnand %p1275_p10, %p1272_p9 }
 0x361   :  { %1280 = shalt.err (!%p1277_p11)
}
 0x362   :  { %877 = dma.vmem_to_hbm [thread:$0]  %s875_s8, 128, %s1428_s7, [#allocation4]  }
 0x363   :  { %1287 = dma.done.wait [#allocation4], 128  }
 0x364   :  { %1288 = vsyncadd [#allocation4], 4294967168 }
 0x365   :  { %881 = vsyncpa [#allocation3], 1 }
 0x366   :  { %882 = vsyncpa [#allocation6], 1 }
 0x367   :  { %883 = vsyncpa [#allocation9], 1 }
 0x368   :  { %884 = vsyncpa [#allocation4], 1 }

</bundles_post_ra>
